<compile_context>
chip_gen: v5e
topology: v5e:2x2
jax: 0.10.0
libtpu: 0.0.40
codegen_flags: <defaults>
</compile_context>

<pallas_src>
import jax
import jax.numpy as jnp
from jax.experimental import pallas as pl
from jax.experimental.pallas import tpu as pltpu


def _z_update_kernel(thr_ref, z_ref, o_ref):
    # thr_ref: (1,1) scalar in SMEM; z_ref/o_ref: (tile_rows, lane) VMEM tiles.
    z = z_ref[...]
    thr = thr_ref[0, 0].astype(z.dtype)
    # Soft-threshold:  z - clip(z, -thr, thr) == sign(z) * max(0, |z| - thr)
    # for thr >= 0 (lam, rho1 > 0 in ADMM).
    o_ref[...] = z - jnp.clip(z, -thr, thr)


def _soft_threshold_ref(z, thr):
    # Pure-JAX reference matching the PyTorch forward exactly.
    return jnp.sign(z) * jnp.maximum(jnp.zeros_like(z), jnp.abs(z) - thr)


def z_update(z_tilde, lam, rho1, *, target_block_bytes=2 * 1024 * 1024):
    """Elementwise soft-threshold of z_tilde with threshold lam/rho1."""
    orig_shape = z_tilde.shape
    dtype = z_tilde.dtype
    n_elem = z_tilde.size

    # Widest lane count (multiple of 128) that evenly divides the element
    # count -> flatten/reshape is a bitcast, no padded copy of the tensor.
    lane = 0
    for cand in (1024, 512, 256, 128):
        if n_elem % cand == 0:
            lane = cand
            break
    if lane == 0 or n_elem == 0:
        # Ragged sizes not divisible by 128 (or empty): a padded Pallas path
        # would cost an extra full HBM pass; plain XLA is already optimal for
        # an elementwise op here.
        return _soft_threshold_ref(z_tilde, lam / rho1).astype(dtype)

    rows = n_elem // lane
    slab = jnp.reshape(z_tilde, (rows, lane))

    # ~2 MiB blocks: big enough to amortize per-step overhead, small enough
    # that (in + out) x 2 double-buffers fits the v5e 16 MiB scoped default.
    itemsize = jnp.dtype(dtype).itemsize
    tile_rows = max(1, target_block_bytes // (lane * itemsize))
    if tile_rows >= rows:
        tile_rows = rows                              # single full-array block
    else:
        tile_rows = max(8, (tile_rows // 8) * 8)      # keep sublane-aligned

    grid = (pl.cdiv(rows, tile_rows),)                # partial last tile is masked
    thr_smem = jnp.reshape(jnp.asarray(lam / rho1, dtype=jnp.float32), (1, 1))

    out_slab = pl.pallas_call(
        _z_update_kernel,
        out_shape=jax.ShapeDtypeStruct((rows, lane), dtype),
        grid=grid,
        in_specs=[
            pl.BlockSpec(memory_space=pltpu.MemorySpace.SMEM),  # scalar threshold
            pl.BlockSpec((tile_rows, lane), lambda i: (i, 0)),
        ],
        out_specs=pl.BlockSpec((tile_rows, lane), lambda i: (i, 0)),
        compiler_params=pltpu.CompilerParams(
            dimension_semantics=("parallel",)),  # lets v7x shard across both TCs
    )(thr_smem, slab)

    return jnp.reshape(out_slab, orig_shape)


if __name__ == "__main__":
    lam, rho1 = 0.1, 0.5

    # Primary test: small NCHW variable consistent with the ADMM module.
    x = jax.random.normal(jax.random.PRNGKey(0), (2, 4, 16, 16), dtype=jnp.float32)
    out = jax.block_until_ready(z_update(x, lam, rho1))
    ref = _soft_threshold_ref(x, lam / rho1)
    assert out.shape == x.shape and out.dtype == x.dtype
    assert jnp.allclose(out, ref, atol=1e-6, rtol=1e-6)

    # Larger input exercising the multi-tile (grid > 1) path with default blocks.
    x2 = jax.random.normal(jax.random.PRNGKey(1), (2, 8, 256, 256), dtype=jnp.float32)
    out2 = jax.block_until_ready(z_update(x2, lam, rho1))
    assert jnp.allclose(out2, _soft_threshold_ref(x2, lam / rho1), atol=1e-6, rtol=1e-6)

    # Partial last tile (rows % tile_rows != 0) exercising Pallas boundary masking.
    x3 = jax.random.normal(jax.random.PRNGKey(2), (2, 4, 100, 128), dtype=jnp.float32)
    out3 = jax.block_until_ready(z_update(x3, lam, rho1, target_block_bytes=32 * 1024))
    assert jnp.allclose(out3, _soft_threshold_ref(x3, lam / rho1), atol=1e-6, rtol=1e-6)

    print("KERNEL_OK")
</pallas_src>

<mosaic_0001>
module attributes {stable_mosaic.version = 11 : i64} {
  func.func @_z_update_kernel(%arg0: i32, %arg1: memref<1x1xf32, #tpu.memory_space<smem>>, %arg2: memref<2x1024xf32, #tpu.memory_space<vmem>>, %arg3: memref<2x1024xf32, #tpu.memory_space<vmem>>) attributes {dimension_semantics = [#tpu.dimension_semantics<parallel>], iteration_bounds = array<i64: 1>, scalar_prefetch = 0 : i64, scratch_operands = 0 : i64, tpu.core_type = #tpu.core_type<tc>, window_params = [{transform_indices = @transform_0, window_bounds = array<i64: 1, 1>}, {transform_indices = @transform_1, window_bounds = array<i64: 2, 1024>}, {transform_indices = @transform_2, window_bounds = array<i64: 2, 1024>}]} {
    %c0 = arith.constant 0 : index
    %c0_0 = arith.constant 0 : index
    %0 = vector.load %arg2[%c0, %c0_0] : memref<2x1024xf32, #tpu.memory_space<vmem>>, vector<2x1024xf32>
    %c0_1 = arith.constant 0 : index
    %c0_2 = arith.constant 0 : index
    %1 = memref.load %arg1[%c0_1, %c0_2] : memref<1x1xf32, #tpu.memory_space<smem>>
    %cst = arith.constant 0.000000e+00 : f32
    %2 = arith.subf %cst, %1 : f32
    %3 = vector.broadcast %2 : f32 to vector<2x1024xf32>
    %4 = arith.maximumf %3, %0 : vector<2x1024xf32>
    %5 = vector.broadcast %1 : f32 to vector<2x1024xf32>
    %6 = arith.minimumf %5, %4 : vector<2x1024xf32>
    %7 = arith.subf %0, %6 : vector<2x1024xf32>
    %c0_3 = arith.constant 0 : index
    %c0_4 = arith.constant 0 : index
    %8 = vector.load %arg3[%c0_3, %c0_4] : memref<2x1024xf32, #tpu.memory_space<vmem>>, vector<2x1024xf32>
    tpu.vector_store %arg3[%c0_3, %c0_4], %7 {strides = array<i32>} : memref<2x1024xf32, #tpu.memory_space<vmem>>, vector<2x1024xf32>,
    return
  }
  func.func @transform_0(%arg0: i32) -> (i32, i32) {
    %c0_i32 = arith.constant 0 : i32
    %c0_i32_0 = arith.constant 0 : i32
    %c0_i32_1 = arith.constant 0 : i32
    return %c0_i32, %c0_i32_0 : i32, i32
  }
  func.func @transform_1(%arg0: i32) -> (i32, i32) {
    %c0_i32 = arith.constant 0 : i32
    %c0_i32_0 = arith.constant 0 : i32
    return %arg0, %c0_i32 : i32, i32
  }
  func.func @transform_2(%arg0: i32) -> (i32, i32) {
    %c0_i32 = arith.constant 0 : i32
    %c0_i32_0 = arith.constant 0 : i32
    return %arg0, %c0_i32 : i32, i32
  }
}

</mosaic_0001>

<bundles_post_ra>
// kernel: tpu_custom_call.1
= control target key start
LH: loop header
LB: loop body
LE: loop exit
PB: predicated region body
PF: predicated region fallthrough
CT: control target
= control target key end

     0   :  { %8 = vsyncpa [#allocation4], 0  ;;  %s141_s0 = inlined_call_operand.<no memory space> [shape: f32[1,1], index: 0, kind: input, shape index: {}]   ;;  %s142_s1 = inlined_call_operand.hbm [shape: f32[2,1024], index: 1, kind: input, shape index: {}]   ;;  %s143_s2 = inlined_call_operand.hbm [shape: f32[2,1024], index: 2, kind: output, shape index: {}]  }
   0x1   :  { %9 = vsyncpa [#allocation5], 0  ;;  %s17_s11 = sshll.u32 %s142_s1, 4  ;;  %s112_s12 = smov [#allocation3]   ;;  %s18_s11 = int_to_ptr.hbm [resolvable:$true] %s17_s11 }
   0x2   :  { %s19_s13 = sshll.u32 %s112_s12, 4  ;;  %s20_s13 = int_to_ptr.vmem [resolvable:$true] %s19_s13 }
   0x3   :  { %22 = dma.hbm_to_vmem [thread:$0]  %s18_s11, 256, %s20_s13, [#allocation4]  }
   0x4   :  { %108 = dma.done.wait [#allocation4], 256  }
   0x5   :  { %109 = vsyncadd [#allocation4], 4294967040  ;;  %s30_s16 = ssub.f32 0.0, %s141_s0  ;;  %v27_v1 = vld [vmem:[#allocation3] sm:$0xff]  ;;  %v34_v2 = vstv %s141_s0  ;;  %v28_v3 = vld [vmem:[#allocation3 + $0x8] sm:$0xff]  ;;  %s113_s1 = smov [#allocation6]  }
   0x6   :  { %s46_s19 = sshll.u32 %s113_s1, 4  ;;  %s48_s22 = sshll.u32 %s143_s2, 4  ;;  %s47_s19 = int_to_ptr.vmem [resolvable:$true] %s46_s19  ;;  %s49_s22 = int_to_ptr.hbm [resolvable:$true] %s48_s22 }
   0x7   :  { %v31_v0 = vstv %s30_s16 }
   0x8   :  { %v32_v4 = vmax.f32 %v31_v0, %v27_v1  ;;  %v33_v5 = vmax.f32 %v31_v0, %v28_v3 }
   0xa   :  { %v35_v6 = vmin.f32 %v34_v2, %v32_v4  ;;  %v36_v7 = vmin.f32 %v34_v2, %v33_v5 }
   0xc   :  { %v37_v8 = vsub.f32 %v27_v1, %v35_v6  ;;  %v38_v9 = vsub.f32 %v28_v3, %v36_v7 }
   0xe   :  { %39 = vst [vmem:[#allocation6] sm:$0xff] %v37_v8 }
   0xf   :  { %40 = vst [vmem:[#allocation6 + $0x8] sm:$0xff] %v38_v9 }
  0x10   :  { %51 = dma.vmem_to_hbm [thread:$0]  %s47_s19, 256, %s49_s22, [#allocation5]  }
  0x11   :  { %110 = dma.done.wait [#allocation5], 256  }
  0x12   :  { %111 = vsyncadd [#allocation5], 4294967040 }
  0x13   :  { %56 = vsyncpa [#allocation4], 1 }
  0x14   :  { %57 = vsyncpa [#allocation5], 1 }

</bundles_post_ra>
